<compile_context>
chip_gen: v7x
topology: tpu7x:2x2x1
jax: 0.10.0
libtpu: 0.0.40
codegen_flags: <defaults>
</compile_context>

<pallas_src>
import jax
import jax.numpy as jnp
from jax.experimental import pallas as pl
from jax.experimental.pallas import tpu as pltpu

LANE = 128  # one full f32 lane row; v_num <= 128 supported


def _uncertainty_kernel(packed_ref, out_ref):
    # packed_ref: (2, LANE) f32 in VMEM. Row 0 = per-task losses (pad 0),
    #             row 1 = sigma (pad 1).
    # out_ref:    (1, 1) f32 in SMEM (scalar result).
    loss = packed_ref[0:1, :]                       # (1, LANE)
    sigma = packed_ref[1:2, :]                      # (1, LANE)
    sig2 = sigma * sigma                            # padding -> 1

    # Fused per-lane term, then a single cross-lane reduction:
    #   loss/(2*sig2) + log(sig2)
    # padded lanes: 0.5 * 0 * 1 + log(1) = 0, so they are an identity.
    term = 0.5 * loss * pl.reciprocal(sig2, approx=False) + jnp.log(sig2)
    out_ref[0, 0] = jnp.sum(term)


def uncertainty_loss(losses, sigma):
    """losses: (v_num,) per-task scalar losses; sigma: (v_num,) parameters."""
    v_num = losses.shape[0]
    assert sigma.shape == (v_num,)
    assert v_num <= LANE, "v_num larger than one lane row not supported here"

    # One lane-dense slab -> a single input buffer / single DMA.
    packed = jnp.stack(
        [
            jnp.pad(losses.astype(jnp.float32), (0, LANE - v_num)),  # pad 0
            jnp.pad(sigma.astype(jnp.float32), (0, LANE - v_num),
                    constant_values=1.0),                            # pad 1
        ],
        axis=0,
    )  # (2, LANE) f32

    out = pl.pallas_call(
        _uncertainty_kernel,
        out_shape=jax.ShapeDtypeStruct((1, 1), jnp.float32),
        in_specs=[pl.BlockSpec(memory_space=pltpu.MemorySpace.VMEM)],
        out_specs=pl.BlockSpec(memory_space=pltpu.MemorySpace.SMEM),
    )(packed)
    return out[0, 0]


def uncertainty_loss_ref(losses, sigma):
    # Pure-jnp reference with the original PyTorch formulation.
    sig2 = sigma.astype(jnp.float32) ** 2
    return (jnp.sum(losses.astype(jnp.float32) / (2.0 * sig2))
            + jnp.log(jnp.prod(sig2)))


if __name__ == "__main__":
    v_num = 4
    key = jax.random.PRNGKey(0)
    k_sigma, k_loss = jax.random.split(key)

    # Deterministic stand-in for the torch.randn(v_num) Parameter; keep |sigma|
    # away from 0 so the loss is well-conditioned for the numerical check.
    sigma = jax.random.normal(k_sigma, (v_num,), dtype=jnp.float32)
    sigma = jnp.where(jnp.abs(sigma) < 0.05, 0.5, sigma)

    # Example scalar per-task losses (what the module receives at call time).
    losses = jnp.abs(jax.random.normal(k_loss, (v_num,), dtype=jnp.float32)) + 0.1

    out = uncertainty_loss(losses, sigma)
    out = jax.block_until_ready(out)

    ref = uncertainty_loss_ref(losses, sigma)
    assert jnp.allclose(out, ref, rtol=1e-4, atol=1e-4), (out, ref)
    print("KERNEL_OK")
</pallas_src>

<mosaic_0001>
module attributes {stable_mosaic.version = 11 : i64} {
  func.func @_uncertainty_kernel(%arg0: memref<2x128xf32, #tpu.memory_space<vmem>>, %arg1: memref<1x1xf32, #tpu.memory_space<smem>>) attributes {dimension_semantics = [], scalar_prefetch = 0 : i64, scratch_operands = 0 : i64, tpu.core_type = #tpu.core_type<tc>} {
    %c0 = arith.constant 0 : index
    %c0_0 = arith.constant 0 : index
    %0 = vector.load %arg0[%c0, %c0_0] : memref<2x128xf32, #tpu.memory_space<vmem>>, vector<1x128xf32>
    %c1 = arith.constant 1 : index
    %c0_1 = arith.constant 0 : index
    %1 = vector.load %arg0[%c1, %c0_1] : memref<2x128xf32, #tpu.memory_space<vmem>>, vector<1x128xf32>
    %2 = arith.mulf %1, %1 : vector<1x128xf32>
    %cst = arith.constant 5.000000e-01 : f32
    %3 = vector.broadcast %cst : f32 to vector<1x128xf32>
    %4 = arith.mulf %3, %0 : vector<1x128xf32>
    %5 = tpu.reciprocal %2 : vector<1x128xf32> -> vector<1x128xf32>
    %6 = arith.mulf %4, %5 : vector<1x128xf32>
    %7 = math.log %2 : vector<1x128xf32>
    %8 = arith.addf %6, %7 : vector<1x128xf32>
    %9 = vector.shape_cast %8 : vector<1x128xf32> to vector<1x1x128xf32>
    %cst_2 = arith.constant dense<0.000000e+00> : vector<1xf32>
    %10 = vector.multi_reduction <add>, %9, %cst_2 [1, 2] : vector<1x1x128xf32> to vector<1xf32>
    %11 = vector.shape_cast %10 : vector<1xf32> to vector<1x1x1xf32>
    %12 = vector.extract %11[0, 0, 0] : f32 from vector<1x1x1xf32>
    %c0_3 = arith.constant 0 : index
    %c0_4 = arith.constant 0 : index
    %13 = memref.load %arg1[%c0_3, %c0_4] : memref<1x1xf32, #tpu.memory_space<smem>>
    memref.store %12, %arg1[%c0_3, %c0_4] : memref<1x1xf32, #tpu.memory_space<smem>>
    return
  }
}

</mosaic_0001>

<bundles_post_ra>
// kernel: tpu_custom_call.1
= control target key start
LH: loop header
LB: loop body
LE: loop exit
PB: predicated region body
PF: predicated region fallthrough
CT: control target
= control target key end

     0   :  { %6 = vsyncpa [#allocation3], 0  ;;  %s137_s0 = inlined_call_operand.hbm [shape: f32[2,128], index: 0, kind: input, shape index: {}]   ;;  %s138_s1 = inlined_call_operand.hbm [shape: f32[1,1], index: 1, kind: output, shape index: {}]  }
   0x1   :  { %7 = vsyncpa [#allocation4], 0  ;;  %s101_s6 = smov [#allocation2]   ;;  %s65_s10 = scalar_lea.hbm %s137_s0, 32 }
   0x2   :  { %s14_s7 = sshll.u32 %s101_s6, 4  ;;  %p66_p0 = scmp.ne.s32.totalorder %s137_s0, %s65_s10  ;;  %s15_s7 = int_to_ptr.vmem [resolvable:$true] %s14_s7 }
   0x3   :  { %p69_p1 = scmp.lt.u32.totalorder %s65_s10, %s137_s0 }
   0x5   :  { %p71_p2 = pnand %p69_p1, %p66_p0 }
   0x7   :  { %74 = shalt.err (!%p71_p2)
}
   0x8   :  { %s75_s15 = scalar_lea.vmem %s15_s7, 32  ;;  %p80_p4 = scmp.lt.s32.totalorder %s15_s7, %s15_s7 }
   0x9   :  { %p76_p3 = scmp.ne.s32.totalorder %s15_s7, %s75_s15  ;;  %p81_p5 = scmp.lt.s32.totalorder %s75_s15, %s75_s15 }
   0xb   :  { %p82_p6 = por %p81_p5, %p80_p4 }
   0xd   :  { %p83_p7 = pnand %p82_p6, %p76_p3 }
   0xf   :  { %86 = shalt.err (!%p83_p7)
}
  0x10   :  { %17 = dma.hbm_to_vmem [thread:$0]  %s137_s0, 32, %s15_s7, [#allocation3]  }
  0x11   :  { %97 = dma.done.wait [#allocation3], 32  }
  0x12   :  { %98 = vsyncadd [#allocation3], 4294967264  ;;  %v22_v0 = vld [vmem:[#allocation2 + $0x1] sm:$0x1]  ;;  %v21_v2 = vld [vmem:[#allocation2] sm:$0x1] }
  0x13   :  { %v23_v1 = vmul.f32 %v22_v0, %v22_v0  ;;  %v24_v3 = vmul.f32 0.5, %v21_v2  ;;  %vm30_vm0 = vcmask 1040384   ;;  %s87_s20 = scalar_lea.hbm %s138_s1, 16 }
  0x14   :  { %p88_p8 = scmp.ne.s32.totalorder %s138_s1, %s87_s20  ;;  %p91_p9 = scmp.lt.u32.totalorder %s87_s20, %s138_s1 }
  0x15   :  { %61 = vrcp.f32 %v23_v1 }
  0x16   :  { %63 = vlog2.f32 %v23_v1  ;;  %p93_p10 = pnand %p91_p9, %p88_p8 }
  0x1f   :  { %v62_v4 = vpop.eup %61 }
  0x20   :  { %v64_v5 = vpop.eup %63  ;;  %v26_v6 = vmul.f32 %v62_v4, %v24_v3 }
  0x21   :  { %v28_v7 = vmul.f32 0.6931472, %v64_v5 }
  0x23   :  { %v29_v8 = vadd.f32 %v28_v7, %v26_v6 }
  0x25   :  { %v31_v9 = vsel %vm30_vm0, %v29_v8, 0.0 }
  0x26   :  { %32 = vadd.xlane.f32.xlu0 %v31_v9 }
  0xb3   :  { %v33_v10 = vpop.xlane.xlu0 %32 }
  0xb4   :  { %v34_v11 = vrot.slane %v33_v10, 4 }
  0xb6   :  { %v35_v12 = vadd.f32 %v34_v11, %v33_v10 }
  0xb8   :  { %v36_v13 = vrot.slane %v35_v12, 2 }
  0xba   :  { %v37_v14 = vadd.f32 %v36_v13, %v35_v12 }
  0xbc   :  { %v38_v15 = vrot.slane %v37_v14, 1 }
  0xbe   :  { %v39_v16 = vadd.f32 %v38_v15, %v37_v14 }
  0xc0   :  { %57 = vpush %v39_v16 }
  0xf1   :  { %s58_s0 = spop %57 }
  0xf2   :  { %42 = sst [smem:[#allocation5]] %s58_s0 }
  0xf3   :  { %96 = shalt.err (!%p93_p10)
}
  0xf4   :  { %s102_s25 = smov [#allocation5]  }
  0xf5   :  { %50 = dma.smem_to_hbm %s102_s25, 16, %s138_s1, [#allocation4]  }
  0xf6   :  { %99 = dma.done.wait [#allocation4], 16  }
  0xf7   :  { %100 = vsyncadd [#allocation4], 4294967280 }
  0xf8   :  { %54 = sfence }
  0xf9   :  { %55 = vsyncpa [#allocation3], 1 }
  0xfa   :  { %56 = vsyncpa [#allocation4], 1 }

</bundles_post_ra>
